<compile_context>
chip_gen: v7x
topology: tpu7x:2x2x1
jax: 0.10.0
libtpu: 0.0.40
codegen_flags: <defaults>
</compile_context>

<pallas_src>
import functools

import jax
import jax.numpy as jnp
from jax.experimental import pallas as pl
from jax.experimental.pallas import tpu as pltpu


def _round_up(x, m):
    return ((x + m - 1) // m) * m


def _mse_loss_kernel(yhat_ref, y_ref, mask_ref, inv_len_ref, out_ref, acc_ref,
                     *, sum_losses):
    j = pl.program_id(1)  # T (reduction) axis, last in grid

    @pl.when(j == 0)
    def _init():
        acc_ref[...] = jnp.zeros_like(acc_ref)

    # Upcast in-kernel (VPU cast) so bf16 inputs stay narrow through the DMA.
    yh = yhat_ref[...].astype(jnp.float32)
    yt = y_ref[...].astype(jnp.float32)
    # Single fused select: where(m, yh, 0) - where(m, y, 0) == where(m, yh - y, 0).
    diff = jnp.where(mask_ref[...] != 0, yh - yt, 0.0)
    acc_ref[...] += jnp.sum(diff * diff, axis=1, keepdims=True)  # (B_tile, 1)

    @pl.when(j == pl.num_programs(1) - 1)
    def _finalize():
        loss = acc_ref[...]
        if not sum_losses:
            loss = loss * inv_len_ref[...]  # precomputed 1/clamp(seq_length, 1)
        out_ref[...] = loss


def _pad2(x, bp, tp, value=0):
    b, t = x.shape
    if bp == b and tp == t:
        return x
    return jnp.pad(x, ((0, bp - b), (0, tp - t)), constant_values=value)


def mse_loss(y_hat, y, mask, seq_length, sum_losses=False,
             block_b=512, block_t=2048):
    """Pallas-TPU masked MSE loss.

    y_hat, y: float (B, T) — any float dtype (kept narrow through DMA)
    mask:     bool / int (B, T)
    seq_length: (B,) or (B, 1) lengths
    Returns a float32 scalar.
    """
    B, T = y_hat.shape

    # Tile sizes: B_tile a multiple of 32 (int8 mask tiling), T_tile a multiple
    # of 128 (lane). Capped so 2 f32 inputs x 2 buffers + int8 mask stay well
    # under 32 MiB scoped VMEM (safe on v5e/v6e/v7x).
    b_tile = min(_round_up(B, 32), _round_up(block_b, 32))
    t_tile = min(_round_up(T, 128), _round_up(block_t, 128))
    Bp = _round_up(B, b_tile)
    Tp = _round_up(T, t_tile)

    # Pad with mask=0 so padded rows/lanes contribute exactly zero.
    yh_p = _pad2(y_hat, Bp, Tp)
    y_p = _pad2(y, Bp, Tp)
    m_p = _pad2(mask.astype(jnp.int8), Bp, Tp)

    inv_len = 1.0 / jnp.maximum(seq_length.reshape(-1).astype(jnp.float32), 1.0)
    inv_len = inv_len.reshape(B, 1)
    if Bp != B:
        inv_len = jnp.pad(inv_len, ((0, Bp - B), (0, 0)), constant_values=1.0)

    grid = (Bp // b_tile, Tp // t_tile)
    kernel = functools.partial(_mse_loss_kernel, sum_losses=sum_losses)

    per_example = pl.pallas_call(
        kernel,
        out_shape=jax.ShapeDtypeStruct((Bp, 1), jnp.float32),
        grid_spec=pltpu.PrefetchScalarGridSpec(
            num_scalar_prefetch=0,
            grid=grid,
            in_specs=[
                pl.BlockSpec((b_tile, t_tile), lambda i, j: (i, j)),
                pl.BlockSpec((b_tile, t_tile), lambda i, j: (i, j)),
                pl.BlockSpec((b_tile, t_tile), lambda i, j: (i, j)),
                pl.BlockSpec((b_tile, 1), lambda i, j: (i, 0)),
            ],
            out_specs=pl.BlockSpec((b_tile, 1), lambda i, j: (i, 0)),
            scratch_shapes=[pltpu.VMEM((b_tile, 1), jnp.float32)],
        ),
        compiler_params=pltpu.CompilerParams(
            dimension_semantics=("parallel", "arbitrary"),
            vmem_limit_bytes=32 * 1024 * 1024,
        ),
    )(yh_p, y_p, m_p, inv_len)

    # Mean over the true batch; padded rows are exactly zero.
    return jnp.sum(per_example) / jnp.float32(B)


def _reference(y_hat, y, mask, seq_length, sum_losses=False):
    y_hat = y_hat.astype(jnp.float32)
    y = y.astype(jnp.float32)
    zeros = jnp.zeros_like(y)
    y_hat = jnp.where(mask, y_hat, zeros)
    y = jnp.where(mask, y, zeros)
    loss = jnp.sum((y_hat - y) ** 2, axis=1)
    if not sum_losses:
        loss = loss / jnp.maximum(seq_length.astype(jnp.float32), 1.0)
    return jnp.mean(loss)


if __name__ == "__main__":
    key = jax.random.PRNGKey(0)
    k1, k2, k3 = jax.random.split(key, 3)

    # Small shapes, deliberately NOT tile-aligned to exercise the padding path.
    B, T = 48, 384
    y_hat = jax.random.normal(k1, (B, T), dtype=jnp.float32)
    y = jax.random.normal(k2, (B, T), dtype=jnp.float32)
    seq_length = jax.random.randint(k3, (B,), minval=0, maxval=T + 1)
    positions = jnp.arange(T)[None, :]
    mask = positions < seq_length[:, None]

    # Default (single-block) tiling.
    out = mse_loss(y_hat, y, mask, seq_length, sum_losses=False)
    jax.block_until_ready(out)
    ref = _reference(y_hat, y, mask, seq_length, sum_losses=False)
    assert jnp.allclose(out, ref, rtol=1e-4, atol=1e-5), (out, ref)

    # Small tiles -> multi-step grid (2 B-tiles x 3 T-tiles) to exercise the
    # accumulate / init / finalize path.
    out_tiled = mse_loss(y_hat, y, mask, seq_length, sum_losses=False,
                         block_b=32, block_t=128)
    jax.block_until_ready(out_tiled)
    assert jnp.allclose(out_tiled, ref, rtol=1e-4, atol=1e-5), (out_tiled, ref)

    # sum_losses=True path.
    out_sum = mse_loss(y_hat, y, mask, seq_length, sum_losses=True,
                       block_b=32, block_t=128)
    jax.block_until_ready(out_sum)
    ref_sum = _reference(y_hat, y, mask, seq_length, sum_losses=True)
    assert jnp.allclose(out_sum, ref_sum, rtol=1e-4, atol=1e-3), (out_sum, ref_sum)

    # bf16 inputs stay bf16 through the DMA and are upcast in-kernel.
    out_bf16 = mse_loss(y_hat.astype(jnp.bfloat16), y.astype(jnp.bfloat16),
                        mask, seq_length, sum_losses=False,
                        block_b=32, block_t=128)
    jax.block_until_ready(out_bf16)
    ref_bf16 = _reference(y_hat.astype(jnp.bfloat16), y.astype(jnp.bfloat16),
                          mask, seq_length, sum_losses=False)
    assert jnp.allclose(out_bf16, ref_bf16, rtol=2e-2, atol=1e-3), (out_bf16, ref_bf16)

    print("KERNEL_OK")
</pallas_src>

<mosaic_0001>
module attributes {stable_mosaic.version = 11 : i64} {
  func.func @_mse_loss_kernel(%arg0: i32, %arg1: i32, %arg2: memref<64x384xf32, #tpu.memory_space<vmem>>, %arg3: memref<64x384xf32, #tpu.memory_space<vmem>>, %arg4: memref<64x384xi8, #tpu.memory_space<vmem>>, %arg5: memref<64x1xf32, #tpu.memory_space<vmem>>, %arg6: memref<64x1xf32, #tpu.memory_space<vmem>>, %arg7: memref<64x1xf32, #tpu.memory_space<vmem>>) attributes {dimension_semantics = [#tpu.dimension_semantics<parallel>, #tpu.dimension_semantics<arbitrary>], iteration_bounds = array<i64: 1, 1>, scalar_prefetch = 0 : i64, scratch_operands = 1 : i64, tpu.core_type = #tpu.core_type<tc>, window_params = [{transform_indices = @transform_0, window_bounds = array<i64: 64, 384>}, {transform_indices = @transform_1, window_bounds = array<i64: 64, 384>}, {transform_indices = @transform_2, window_bounds = array<i64: 64, 384>}, {transform_indices = @transform_3, window_bounds = array<i64: 64, 1>}, {transform_indices = @transform_4, window_bounds = array<i64: 64, 1>}]} {
    %c0_i32 = arith.constant 0 : i32
    %0 = arith.cmpi eq, %arg1, %c0_i32 : i32
    %1 = arith.extui %0 : i1 to i32
    %c0_i32_0 = arith.constant 0 : i32
    %2 = arith.cmpi ne, %1, %c0_i32_0 : i32
    scf.if %2 {
      %cst_13 = arith.constant 0.000000e+00 : f32
      %20 = vector.broadcast %cst_13 : f32 to vector<64x1xf32>
      %c0_14 = arith.constant 0 : index
      %c0_15 = arith.constant 0 : index
      %21 = vector.load %arg7[%c0_14, %c0_15] : memref<64x1xf32, #tpu.memory_space<vmem>>, vector<64x1xf32>
      tpu.vector_store %arg7[%c0_14, %c0_15], %20 {strides = array<i32>} : memref<64x1xf32, #tpu.memory_space<vmem>>, vector<64x1xf32>,
    } else {
    }
    %c0 = arith.constant 0 : index
    %c0_1 = arith.constant 0 : index
    %3 = vector.load %arg2[%c0, %c0_1] : memref<64x384xf32, #tpu.memory_space<vmem>>, vector<64x384xf32>
    %c0_2 = arith.constant 0 : index
    %c0_3 = arith.constant 0 : index
    %4 = vector.load %arg3[%c0_2, %c0_3] : memref<64x384xf32, #tpu.memory_space<vmem>>, vector<64x384xf32>
    %c0_4 = arith.constant 0 : index
    %c0_5 = arith.constant 0 : index
    %5 = vector.load %arg4[%c0_4, %c0_5] : memref<64x384xi8, #tpu.memory_space<vmem>>, vector<64x384xi8>
    %c0_i8 = arith.constant 0 : i8
    %6 = vector.broadcast %c0_i8 : i8 to vector<64x384xi8>
    %7 = arith.cmpi ne, %5, %6 : vector<64x384xi8>
    %8 = arith.subf %3, %4 : vector<64x384xf32>
    %cst = arith.constant 0.000000e+00 : f32
    %9 = vector.broadcast %cst : f32 to vector<64x384xf32>
    %10 = arith.select %7, %8, %9 : vector<64x384xi1>, vector<64x384xf32>
    %c0_6 = arith.constant 0 : index
    %c0_7 = arith.constant 0 : index
    %11 = vector.load %arg7[%c0_6, %c0_7] : memref<64x1xf32, #tpu.memory_space<vmem>>, vector<64x1xf32>
    %12 = arith.mulf %10, %10 : vector<64x384xf32>
    %cst_8 = arith.constant dense<0.000000e+00> : vector<64xf32>
    %13 = vector.multi_reduction <add>, %12, %cst_8 [1] : vector<64x384xf32> to vector<64xf32>
    %14 = vector.shape_cast %13 : vector<64xf32> to vector<64x1xf32>
    %15 = arith.addf %11, %14 : vector<64x1xf32>
    %c0_9 = arith.constant 0 : index
    %c0_10 = arith.constant 0 : index
    %16 = vector.load %arg7[%c0_9, %c0_10] : memref<64x1xf32, #tpu.memory_space<vmem>>, vector<64x1xf32>
    tpu.vector_store %arg7[%c0_9, %c0_10], %15 {strides = array<i32>} : memref<64x1xf32, #tpu.memory_space<vmem>>, vector<64x1xf32>,
    %c0_i32_11 = arith.constant 0 : i32
    %17 = arith.cmpi eq, %arg1, %c0_i32_11 : i32
    %18 = arith.extui %17 : i1 to i32
    %c0_i32_12 = arith.constant 0 : i32
    %19 = arith.cmpi ne, %18, %c0_i32_12 : i32
    scf.if %19 {
      %c0_13 = arith.constant 0 : index
      %c0_14 = arith.constant 0 : index
      %20 = vector.load %arg7[%c0_13, %c0_14] : memref<64x1xf32, #tpu.memory_space<vmem>>, vector<64x1xf32>
      %c0_15 = arith.constant 0 : index
      %c0_16 = arith.constant 0 : index
      %21 = vector.load %arg5[%c0_15, %c0_16] : memref<64x1xf32, #tpu.memory_space<vmem>>, vector<64x1xf32>
      %22 = arith.mulf %20, %21 : vector<64x1xf32>
      %c0_17 = arith.constant 0 : index
      %c0_18 = arith.constant 0 : index
      %23 = vector.load %arg6[%c0_17, %c0_18] : memref<64x1xf32, #tpu.memory_space<vmem>>, vector<64x1xf32>
      tpu.vector_store %arg6[%c0_17, %c0_18], %22 {strides = array<i32>} : memref<64x1xf32, #tpu.memory_space<vmem>>, vector<64x1xf32>,
    } else {
    }
    return
  }
  func.func @transform_0(%arg0: i32, %arg1: i32) -> (i32, i32) {
    %c0_i32 = arith.constant 0 : i32
    return %arg0, %arg1 : i32, i32
  }
  func.func @transform_1(%arg0: i32, %arg1: i32) -> (i32, i32) {
    %c0_i32 = arith.constant 0 : i32
    return %arg0, %arg1 : i32, i32
  }
  func.func @transform_2(%arg0: i32, %arg1: i32) -> (i32, i32) {
    %c0_i32 = arith.constant 0 : i32
    return %arg0, %arg1 : i32, i32
  }
  func.func @transform_3(%arg0: i32, %arg1: i32) -> (i32, i32) {
    %c0_i32 = arith.constant 0 : i32
    %c0_i32_0 = arith.constant 0 : i32
    return %arg0, %c0_i32 : i32, i32
  }
  func.func @transform_4(%arg0: i32, %arg1: i32) -> (i32, i32) {
    %c0_i32 = arith.constant 0 : i32
    %c0_i32_0 = arith.constant 0 : i32
    return %arg0, %c0_i32 : i32, i32
  }
}

</mosaic_0001>

<bundles_post_ra>
// kernel: tpu_custom_call.1
= control target key start
LH: loop header
LB: loop body
LE: loop exit
PB: predicated region body
PF: predicated region fallthrough
CT: control target
= control target key end

     0   :  { %9 = vsyncpa [#allocation4], 0  ;;  %s777_s0 = inlined_call_operand.hbm [shape: f32[64,384], index: 0, kind: input, shape index: {}]   ;;  %s778_s1 = inlined_call_operand.hbm [shape: f32[64,384], index: 1, kind: input, shape index: {}]   ;;  %s779_s2 = inlined_call_operand.vmem [shape: s8[64,384], index: 2, kind: input, shape index: {}]   ;;  %s780_s3 = inlined_call_operand.vmem [shape: f32[64,1], index: 3, kind: input, shape index: {}]   ;;  %s781_s4 = inlined_call_operand.vmem [shape: f32[64,1], index: 4, kind: output, shape index: {}]  }
   0x1   :  { %10 = vsyncpa [#allocation6], 0  ;;  %s462_s15 = smov [#allocation3]   ;;  %s414_s19 = scalar_lea.hbm %s777_s0, 3072 }
   0x2   :  { %s16_s16 = sshll.u32 %s462_s15, 4  ;;  %p415_p0 = scmp.ne.s32.totalorder %s777_s0, %s414_s19  ;;  %s17_s16 = int_to_ptr.vmem [resolvable:$true] %s16_s16 }
   0x3   :  { %p418_p1 = scmp.lt.u32.totalorder %s414_s19, %s777_s0 }
   0x5   :  { %p420_p2 = pnand %p418_p1, %p415_p0 }
   0x7   :  { %423 = shalt.err (!%p420_p2)
}
   0x8   :  { %s424_s24 = scalar_lea.vmem %s17_s16, 3072  ;;  %p429_p4 = scmp.lt.s32.totalorder %s17_s16, %s17_s16 }
   0x9   :  { %p425_p3 = scmp.ne.s32.totalorder %s17_s16, %s424_s24  ;;  %p430_p5 = scmp.lt.s32.totalorder %s424_s24, %s424_s24 }
   0xb   :  { %p431_p6 = por %p430_p5, %p429_p4 }
   0xd   :  { %p432_p7 = pnand %p431_p6, %p425_p3 }
   0xf   :  { %435 = shalt.err (!%p432_p7)
}
  0x10   :  { %s463_s25 = smov 384   ;;  %s464_s26 = smov 24  }
  0x11   :  { %22 = dma.hbm_to_vmem [thread:$0]  %s777_s0, 3072, %s17_s16, [#allocation4], %s463_s25, %s463_s25, %s464_s26  }
  0x12   :  { %s465_s29 = smov [#allocation5]   ;;  %s436_s7 = scalar_lea.hbm %s778_s1, 3072 }
  0x13   :  { %s28_s30 = sshll.u32 %s465_s29, 4  ;;  %p437_p8 = scmp.ne.s32.totalorder %s778_s1, %s436_s7  ;;  %s29_s30 = int_to_ptr.vmem [resolvable:$true] %s28_s30 }
  0x14   :  { %p440_p9 = scmp.lt.u32.totalorder %s436_s7, %s778_s1 }
  0x16   :  { %p442_p10 = pnand %p440_p9, %p437_p8 }
  0x18   :  { %445 = shalt.err (!%p442_p10)
}
  0x19   :  { %s446_s12 = scalar_lea.vmem %s29_s30, 3072  ;;  %p451_p12 = scmp.lt.s32.totalorder %s29_s30, %s29_s30 }
  0x1a   :  { %p447_p11 = scmp.ne.s32.totalorder %s29_s30, %s446_s12  ;;  %p452_p13 = scmp.lt.s32.totalorder %s446_s12, %s446_s12 }
  0x1c   :  { %p453_p0 = por %p452_p13, %p451_p12 }
  0x1e   :  { %p454_p1 = pnand %p453_p0, %p447_p11 }
  0x20   :  { %457 = shalt.err (!%p454_p1)
}
  0x21   :  { %34 = dma.hbm_to_vmem [thread:$0]  %s778_s1, 3072, %s29_s30, [#allocation6], %s463_s25, %s463_s25, %s464_s26  }
  0x22   :  { %458 = dma.done.wait [#allocation4], 3072  }
  0x23   :  { %459 = vsyncadd [#allocation4], 4294964224 }
  0x24   :  { %460 = dma.done.wait [#allocation6], 3072  }
  0x25   :  { %461 = vsyncadd [#allocation6], 4294964224  ;;  %vm51_vm0 = vcmask 7168   ;;  %v466_v0 = vmov 0.0   ;;  %v525_v1 = vld [vmem:[#allocation3 + $0x30] sm:$0xff]  ;;  %v527_v2 = vld [vmem:[#allocation3 + $0x38] sm:$0xff] }
  0x26   :  { %54 = vst.msk [vmem:[#allocation2 + $0x10] sm:$0xff] %vm51_vm0, %v466_v0  ;;  %52 = vst.msk [vmem:[#allocation2] sm:$0xff] %vm51_vm0, %v466_v0  ;;  %v529_v3 = vld [vmem:[#allocation3 + $0x40] sm:$0xff]  ;;  %v531_v4 = vld [vmem:[#allocation5 + $0x30] sm:$0xff]  ;;  %v467_v14 = vmov 0  }
  0x27   :  { %53 = vst.msk [vmem:[#allocation2 + $0x8] sm:$0xff] %vm51_vm0, %v466_v0  ;;  %55 = vst.msk [vmem:[#allocation2 + $0x18] sm:$0xff] %vm51_vm0, %v466_v0  ;;  %v533_v5 = vld [vmem:[#allocation5 + $0x38] sm:$0xff]  ;;  %v535_v6 = vld [vmem:[#allocation5 + $0x40] sm:$0xff]  ;;  %v126_v13 = vsub.f32 %v525_v1, %v531_v4 }
  0x28   :  { %56 = vst.msk [vmem:[#allocation2 + $0x20] sm:$0xff] %vm51_vm0, %v466_v0  ;;  %57 = vst.msk [vmem:[#allocation2 + $0x28] sm:$0xff] %vm51_vm0, %v466_v0  ;;  %v108_v7 = vld [vmem:[%s779_s2] sm:$0xff]  ;;  %v109_v8 = vld [vmem:[%s779_s2 + $0x8] sm:$0xff]  ;;  %v127_v25 = vsub.f32 %v527_v2, %v533_v5  ;;  %v128_v26 = vsub.f32 %v529_v3, %v535_v6 }
  0x29   :  { %58 = vst.msk [vmem:[#allocation2 + $0x30] sm:$0xff] %vm51_vm0, %v466_v0  ;;  %59 = vst.msk [vmem:[#allocation2 + $0x38] sm:$0xff] %vm51_vm0, %v466_v0  ;;  %v110_v9 = vld [vmem:[%s779_s2 + $0x10] sm:$0xff]  ;;  %vm114_vm1 = vnez %v108_v7  ;;  %vm115_vm2 = vnez %v109_v8  ;;  %v546_v10 = vld [vmem:[#allocation3] sm:$0xff] }
  0x2a   :  { %vm116_vm3 = vnez %v110_v9  ;;  %v548_v11 = vld [vmem:[#allocation3 + $0x8] sm:$0xff]  ;;  %v550_v12 = vld [vmem:[#allocation3 + $0x10] sm:$0xff]  ;;  %v144_v15 = vsel %vm114_vm1, 16843009, %v467_v14  ;;  %v145_v16 = vsel %vm115_vm2, 16843009, %v467_v14 }
  0x2b   :  { %v146_v17 = vsel %vm116_vm3, 16843009, %v467_v14  ;;  %v156_v18 = vunpack.c.2.s8 %v144_v15  ;;  %v157_v19 = vunpack.c.2.s8 %v145_v16  ;;  %v557_v21 = vld [vmem:[#allocation5] sm:$0xff]  ;;  %v559_v22 = vld [vmem:[#allocation5 + $0x8] sm:$0xff]  ;;  %v561_v23 = vld [vmem:[#allocation5 + $0x10] sm:$0xff]  ;;  %v150_v24 = vunpack.c.0.s8 %v144_v15 }
  0x2c   :  { %v158_v20 = vunpack.c.2.s8 %v146_v17  ;;  %v120_v27 = vsub.f32 %v546_v10, %v557_v21  ;;  %v151_v28 = vunpack.c.0.s8 %v145_v16  ;;  %v569_v29 = vld [vmem:[#allocation3 + $0x48] sm:$0xff]  ;;  %v571_v30 = vld [vmem:[#allocation3 + $0x50] sm:$0xff]  ;;  %v573_v31 = vld [vmem:[#allocation3 + $0x58] sm:$0xff]  ;;  %v152_v34 = vunpack.c.0.s8 %v146_v17 }
  0x2d   :  { %v180_v32 = vpack.c.b16 %v157_v19, %v156_v18  ;;  %v575_v35 = vld [vmem:[#allocation5 + $0x48] sm:$0xff]  ;;  %v577_v36 = vld [vmem:[#allocation5 + $0x50] sm:$0xff]  ;;  %v579_v37 = vld [vmem:[#allocation5 + $0x58] sm:$0xff]  ;;  %v159_v38 = vunpack.c.3.s8 %v144_v15  ;;  %v121_v39 = vsub.f32 %v548_v11, %v559_v22  ;;  %v122_v40 = vsub.f32 %v550_v12, %v561_v23 }
  0x2e   :  { %v181_v33 = vpack.c.b16 %v158_v20, %v158_v20  ;;  %v174_v41 = vpack.c.b16 %v151_v28, %v150_v24  ;;  %v129_v42 = vsub.f32 %v569_v29, %v575_v35  ;;  %v587_v43 = vld [vmem:[#allocation3 + $0x18] sm:$0xff]  ;;  %v175_v45 = vpack.c.b16 %v152_v34, %v152_v34  ;;  %v589_v48 = vld [vmem:[#allocation3 + $0x20] sm:$0xff]  ;;  %v65_v20 = vld [vmem:[#allocation3 + $0x28] sm:$0xff] }
  0x2f   :  { %v160_v46 = vunpack.c.3.s8 %v145_v16  ;;  %v161_v47 = vunpack.c.3.s8 %v146_v17  ;;  %v591_v49 = vld [vmem:[#allocation5 + $0x18] sm:$0xff]  ;;  %v593_v50 = vld [vmem:[#allocation5 + $0x20] sm:$0xff]  ;;  %v130_v51 = vsub.f32 %v571_v30, %v577_v36  ;;  %v131_v52 = vsub.f32 %v573_v31, %v579_v37  ;;  %v89_v21 = vld [vmem:[#allocation5 + $0x28] sm:$0xff] }
  0x30   :  { %v182_v44 = vpack.c.b8 %v181_v33, %v180_v32  ;;  %v123_v53 = vsub.f32 %v587_v43, %v591_v49  ;;  %v153_v54 = vunpack.c.1.s8 %v144_v15  ;;  %v176_v55 = vpack.c.b8 %v175_v45, %v174_v41  ;;  %v112_v45 = vld [vmem:[%s779_s2 + $0x20] sm:$0xff]  ;;  %v634_v37 = vld [vmem:[#allocation5 + $0x78] sm:$0xff] }
  0x31   :  { %v183_v56 = vpack.c.b16 %v160_v46, %v159_v38  ;;  %v184_v57 = vpack.c.b16 %v161_v47, %v161_v47  ;;  %v124_v59 = vsub.f32 %v589_v48, %v593_v50  ;;  %v154_v60 = vunpack.c.1.s8 %v145_v16  ;;  %v113_v46 = vld [vmem:[%s779_s2 + $0x28] sm:$0xff]  ;;  %v657_v48 = vld [vmem:[#allocation3 + $0x70] sm:$0xff] }
  0x32   :  { %vm200_vm4 = vnez %v182_v44  ;;  %v155_v61 = vunpack.c.1.s8 %v146_v17  ;;  %vm198_vm5 = vnez %v176_v55  ;;  %v125_v41 = vsub.f32 %v65_v20, %v89_v21  ;;  %v677_v20 = vld [vmem:[#allocation3 + $0xb0] sm:$0xff]  ;;  %v679_v21 = vld [vmem:[#allocation5 + $0xa8] sm:$0xff] }
  0x33   :  { %v208_v58 = vsel %vm200_vm4, 16843009, %v467_v14  ;;  %v206_v1 = vsel %vm198_vm5, 16843009, %v467_v14  ;;  %v185_v2 = vpack.c.b8 %v184_v57, %v183_v56  ;;  %v177_v3 = vpack.c.b16 %v154_v60, %v153_v54  ;;  %v627_v56 = vld [vmem:[#allocation3 + $0x80] sm:$0xff]  ;;  %v629_v57 = vld [vmem:[#allocation3 + $0x88] sm:$0xff] }
  0x34   :  { %v220_v62 = vunpack.c.0.s8 %v208_v58  ;;  %v221_v63 = vunpack.c.1.s8 %v208_v58  ;;  %v222_v0 = vunpack.c.2.s8 %v208_v58  ;;  %v178_v4 = vpack.c.b16 %v155_v61, %v155_v61 }
  0x35   :  { %v214_v5 = vunpack.c.0.s8 %v206_v1  ;;  %v215_v9 = vunpack.c.1.s8 %v206_v1  ;;  %v216_v15 = vunpack.c.2.s8 %v206_v1  ;;  %vm201_vm11 = vnez %v185_v2  ;;  %v647_v1 = vld [vmem:[#allocation3 + $0x60] sm:$0xff] }
  0x36   :  { %vm244_vm6 = vcmp.ne.s32.totalorder %v220_v62, 0  ;;  %vm245_vm7 = vcmp.ne.s32.totalorder %v221_v63, 0  ;;  %vm246_vm8 = vcmp.ne.s32.totalorder %v222_v0, 0  ;;  %v179_v16 = vpack.c.b8 %v178_v4, %v177_v3  ;;  %v643_v63 = vld [vmem:[#allocation5 + $0x80] sm:$0xff]  ;;  %v645_v0 = vld [vmem:[#allocation5 + $0x88] sm:$0xff] }
  0x37   :  { %v268_v6 = vsel %vm244_vm6, %v126_v13, 0.0  ;;  %v269_v7 = vsel %vm245_vm7, %v127_v25, 0.0  ;;  %v270_v8 = vsel %vm246_vm8, %v128_v26, 0.0  ;;  %vm238_vm9 = vcmp.ne.s32.totalorder %v214_v5, 0  ;;  %v111_v25 = vld [vmem:[%s779_s2 + $0x18] sm:$0xff]  ;;  %v655_v3 = vld [vmem:[#allocation3 + $0x68] sm:$0xff] }
  0x38   :  { %v300_v10 = vmul.f32 %v268_v6, %v268_v6  ;;  %v301_v11 = vmul.f32 %v269_v7, %v269_v7  ;;  %v302_v12 = vmul.f32 %v270_v8, %v270_v8  ;;  %vm239_vm10 = vcmp.ne.s32.totalorder %v215_v9, 0  ;;  %v663_v6 = vld [vmem:[#allocation5 + $0x60] sm:$0xff]  ;;  %v665_v7 = vld [vmem:[#allocation5 + $0x68] sm:$0xff]  ;;  %v667_v8 = vld [vmem:[#allocation5 + $0x70] sm:$0xff] }
  0x39   :  { %vm240_vm12 = vcmp.ne.s32.totalorder %v216_v15, 0  ;;  %v262_v18 = vsel %vm238_vm9, %v120_v27, 0.0  ;;  %v263_v19 = vsel %vm239_vm10, %v121_v39, 0.0  ;;  %v209_v24 = vsel %vm201_vm11, 16843009, %v467_v14  ;;  %v674_v15 = vld [vmem:[#allocation3 + $0xa8] sm:$0xff] }
  0x3a   :  { %v326_v17 = vadd.f32 %v301_v11, %v300_v10  ;;  %v264_v22 = vsel %vm240_vm12, %v122_v40, 0.0  ;;  %v294_v23 = vmul.f32 %v262_v18, %v262_v18  ;;  %v295_v13 = vmul.f32 %v263_v19, %v263_v19 }
  0x3b   :  { %v296_v28 = vmul.f32 %v264_v22, %v264_v22  ;;  %v223_v32 = vunpack.c.0.s8 %v209_v24  ;;  %v224_v33 = vunpack.c.1.s8 %v209_v24  ;;  %v225_v38 = vunpack.c.2.s8 %v209_v24  ;;  %v681_v22 = vld [vmem:[#allocation5 + $0xb0] sm:$0xff] }
  0x3c   :  { %v327_v26 = vadd.f32 %v326_v17, %v302_v12  ;;  %v318_v34 = vadd.f32 %v295_v13, %v294_v23  ;;  %vm199_vm13 = vnez %v179_v16  ;;  %vm117_vm1 = vnez %v111_v25 }
  0x3d   :  { %vm247_vm14 = vcmp.ne.s32.totalorder %v223_v32, 0  ;;  %vm248_vm15 = vcmp.ne.s32.totalorder %v224_v33, 0  ;;  %v207_v27 = vsel %vm199_vm13, 16843009, %v467_v14  ;;  %vm249_vm2 = vcmp.ne.s32.totalorder %v225_v38, 0 }
  0x3e   :  { %328 = vadd.xlane.f32.xlu1 %v327_v26  ;;  %v319_v39 = vadd.f32 %v318_v34, %v296_v28  ;;  %v271_v40 = vsel %vm247_vm14, %v129_v42, 0.0  ;;  %v272_v44 = vsel %vm248_vm15, %v130_v51, 0.0  ;;  %v273_v47 = vsel %vm249_vm2, %v131_v52, 0.0  ;;  %v625_v51 = vld [vmem:[#allocation3 + $0x78] sm:$0xff] }
  0x3f   :  { %v303_v54 = vmul.f32 %v271_v40, %v271_v40  ;;  %v304_v55 = vmul.f32 %v272_v44, %v272_v44  ;;  %v217_v29 = vunpack.c.0.s8 %v207_v27  ;;  %v305_v35 = vmul.f32 %v273_v47, %v273_v47  ;;  %v689_v26 = vld [vmem:[#allocation3 + $0xb8] sm:$0xff] }
  0x40   :  { %320 = vadd.xlane.f32.xlu0 %v319_v39  ;;  %v218_v42 = vunpack.c.1.s8 %v207_v27  ;;  %v219_v30 = vunpack.c.2.s8 %v207_v27  ;;  %vm118_vm4 = vnez %v112_v45  ;;  %vm119_vm5 = vnez %v113_v46  ;;  %v691_v28 = vld [vmem:[#allocation5 + $0xb8] sm:$0xff] }
  0x41   :  { %v330_v36 = vadd.f32 %v304_v55, %v303_v54  ;;  %vm241_vm3 = vcmp.ne.s32.totalorder %v217_v29, 0  ;;  %v638_v52 = vsel %vm117_vm1, 16843009, %v467_v14  ;;  %v653_v2 = vsel %vm119_vm5, 16843009, %v467_v14 }
  0x42   :  { %vm242_vm6 = vcmp.ne.s32.totalorder %v218_v42, 0  ;;  %vm243_vm7 = vcmp.ne.s32.totalorder %v219_v30, 0  ;;  %v265_v31 = vsel %vm241_vm3, %v123_v53, 0.0  ;;  %v148_v53 = vsel %vm118_vm4, 16843009, %v467_v14 }
  0x43   :  { %v331_v58 = vadd.f32 %v330_v36, %v305_v35  ;;  %v266_v60 = vsel %vm242_vm6, %v124_v59, 0.0  ;;  %v267_v61 = vsel %vm243_vm7, %v125_v41, 0.0  ;;  %v297_v62 = vmul.f32 %v265_v31, %v265_v31 }
  0x44   :  { %v298_v43 = vmul.f32 %v266_v60, %v266_v60  ;;  %v299_v49 = vmul.f32 %v267_v61, %v267_v61  ;;  %v135_v50 = vsub.f32 %v625_v51, %v634_v37  ;;  %v165_v59 = vunpack.c.1.s8 %v638_v52 }
  0x45   :  { %332 = vadd.xlane.f32.xlu1 %v331_v58  ;;  %v166_v4 = vunpack.c.1.s8 %v148_v53  ;;  %v167_v5 = vunpack.c.1.s8 %v653_v2  ;;  %v136_v10 = vsub.f32 %v627_v56, %v643_v63  ;;  %v137_v11 = vsub.f32 %v629_v57, %v645_v0 }
  0x46   :  { %v322_v9 = vadd.f32 %v298_v43, %v297_v62  ;;  %v162_v12 = vunpack.c.0.s8 %v638_v52  ;;  %v163_v18 = vunpack.c.0.s8 %v148_v53  ;;  %v164_v19 = vunpack.c.0.s8 %v653_v2 }
  0x47   :  { %v189_v16 = vpack.c.b16 %v166_v4, %v165_v59  ;;  %v190_v17 = vpack.c.b16 %v167_v5, %v167_v5  ;;  %v132_v13 = vsub.f32 %v647_v1, %v663_v6  ;;  %v133_v24 = vsub.f32 %v655_v3, %v665_v7  ;;  %v78_v59 = vld [vmem:[#allocation3 + $0x90] sm:$0xff] }
  0x48   :  { %v323_v23 = vadd.f32 %v322_v9, %v299_v49  ;;  %v134_v25 = vsub.f32 %v657_v48, %v667_v8  ;;  %v186_v33 = vpack.c.b16 %v163_v18, %v162_v12  ;;  %v187_v34 = vpack.c.b16 %v164_v19, %v164_v19  ;;  %v102_v4 = vld [vmem:[#allocation5 + $0x90] sm:$0xff]  ;;  %v104_v18 = vld [vmem:[#allocation5 + $0xa0] sm:$0xff] }
  0x49   :  { %v191_v32 = vpack.c.b8 %v190_v17, %v189_v16  ;;  %v171_v38 = vunpack.c.3.s8 %v638_v52  ;;  %v141_v41 = vsub.f32 %v674_v15, %v679_v21  ;;  %v142_v27 = vsub.f32 %v677_v20, %v681_v22  ;;  %v80_v16 = vld [vmem:[#allocation3 + $0xa0] sm:$0xff]  ;;  %v103_v17 = vld [vmem:[#allocation5 + $0x98] sm:$0xff] }
  0x4a   :  { %324 = vadd.xlane.f32.xlu0 %v323_v23  ;;  %v172_v39 = vunpack.c.3.s8 %v148_v53  ;;  %v173_v40 = vunpack.c.3.s8 %v653_v2  ;;  %v188_v44 = vpack.c.b8 %v187_v34, %v186_v33  ;;  %v143_v45 = vsub.f32 %v689_v26, %v691_v28 }
  0x4b   :  { %vm203_vm8 = vnez %v191_v32  ;;  %v168_v46 = vunpack.c.2.s8 %v638_v52  ;;  %v169_v29 = vunpack.c.2.s8 %v148_v53  ;;  %v170_v56 = vunpack.c.2.s8 %v653_v2 }
  0x4c   :  { %v211_v47 = vsel %vm203_vm8, 16843009, %v467_v14  ;;  %v195_v54 = vpack.c.b16 %v172_v39, %v171_v38  ;;  %v196_v55 = vpack.c.b16 %v173_v40, %v173_v40  ;;  %vm202_vm9 = vnez %v188_v44 }
  0x4d   :  { %v229_v35 = vunpack.c.0.s8 %v211_v47  ;;  %v230_v42 = vunpack.c.1.s8 %v211_v47  ;;  %v231_v30 = vunpack.c.2.s8 %v211_v47  ;;  %v210_v36 = vsel %vm202_vm9, 16843009, %v467_v14 }
  0x4e   :  { %v197_v51 = vpack.c.b8 %v196_v55, %v195_v54  ;;  %v192_v57 = vpack.c.b16 %v169_v29, %v168_v46  ;;  %v226_v31 = vunpack.c.0.s8 %v210_v36  ;;  %v227_v60 = vunpack.c.1.s8 %v210_v36  ;;  %v288_v55 = vld [vmem:[#allocation2 + $0x10] sm:$0xff] }
  0x4f   :  { %vm253_vm10 = vcmp.ne.s32.totalorder %v229_v35, 0  ;;  %vm254_vm11 = vcmp.ne.s32.totalorder %v230_v42, 0  ;;  %vm255_vm12 = vcmp.ne.s32.totalorder %v231_v30, 0  ;;  %v228_v0 = vunpack.c.2.s8 %v210_v36  ;;  %v286_v35 = vld [vmem:[#allocation2] sm:$0xff]  ;;  %v289_v36 = vld [vmem:[#allocation2 + $0x18] sm:$0xff] }
  0x50   :  { %v277_v37 = vsel %vm253_vm10, %v135_v50, 0.0  ;;  %v278_v52 = vsel %vm254_vm11, %v136_v10, 0.0  ;;  %v279_v58 = vsel %vm255_vm12, %v137_v11, 0.0  ;;  %vm250_vm13 = vcmp.ne.s32.totalorder %v226_v31, 0  ;;  %v79_v11 = vld [vmem:[#allocation3 + $0x98] sm:$0xff] }
  0x51   :  { %v309_v61 = vmul.f32 %v277_v37, %v277_v37  ;;  %v310_v62 = vmul.f32 %v278_v52, %v278_v52  ;;  %v311_v63 = vmul.f32 %v279_v58, %v279_v58  ;;  %vm251_vm14 = vcmp.ne.s32.totalorder %v227_v60, 0  ;;  %v378_v52 = vld [vmem:[%s780_s3] sm:$0xff]  ;;  %v287_v58 = vld [vmem:[#allocation2 + $0x8] sm:$0xff] }
  0x52   :  { %vm205_vm15 = vnez %v197_v51  ;;  %v193_v1 = vpack.c.b16 %v170_v56, %v170_v56  ;;  %vm252_vm1 = vcmp.ne.s32.totalorder %v228_v0, 0  ;;  %v274_v49 = vsel %vm250_vm13, %v132_v13, 0.0  ;;  %v380_v51 = vld [vmem:[%s780_s3 + $0x10] sm:$0xff]  ;;  %v381_v0 = vld [vmem:[%s780_s3 + $0x18] sm:$0xff] }
  0x53   :  { %v338_v43 = vadd.f32 %v310_v62, %v309_v61  ;;  %v275_v53 = vsel %vm251_vm14, %v133_v24, 0.0  ;;  %v276_v2 = vsel %vm252_vm1, %v134_v25, 0.0  ;;  %v306_v3 = vmul.f32 %v274_v49, %v274_v49  ;;  %v379_v49 = vld [vmem:[%s780_s3 + $0x8] sm:$0xff] }
  0x54   :  { %v307_v48 = vmul.f32 %v275_v53, %v275_v53  ;;  %v213_v50 = vsel %vm205_vm15, 16843009, %v467_v14  ;;  %v308_v6 = vmul.f32 %v276_v2, %v276_v2  ;;  %v194_v12 = vpack.c.b8 %v193_v1, %v192_v57 }
  0x55   :  { %v339_v5 = vadd.f32 %v338_v43, %v311_v63  ;;  %v235_v7 = vunpack.c.0.s8 %v213_v50  ;;  %v236_v8 = vunpack.c.1.s8 %v213_v50  ;;  %v237_v10 = vunpack.c.2.s8 %v213_v50 }
  0x56   :  { %v334_v9 = vadd.f32 %v307_v48, %v306_v3  ;;  %v138_v19 = vsub.f32 %v78_v59, %v102_v4  ;;  %vm204_vm5 = vnez %v194_v12  ;;  %v139_v33 = vsub.f32 %v79_v11, %v103_v17  ;;  %v291_v3 = vld [vmem:[#allocation2 + $0x28] sm:$0xff]  ;;  %v290_v59 = vld [vmem:[#allocation2 + $0x20] sm:$0xff] }
  0x57   :  { %340 = vadd.xlane.f32.xlu1 %v339_v5  ;;  %vm259_vm2 = vcmp.ne.s32.totalorder %v235_v7, 0  ;;  %vm260_vm3 = vcmp.ne.s32.totalorder %v236_v8, 0  ;;  %vm261_vm4 = vcmp.ne.s32.totalorder %v237_v10, 0  ;;  %v140_v34 = vsub.f32 %v80_v16, %v104_v18  ;;  %v383_v7 = vld [vmem:[%s780_s3 + $0x28] sm:$0xff]  ;;  %v382_v12 = vld [vmem:[%s780_s3 + $0x20] sm:$0xff]  ;;  %v292_v16 = vld [vmem:[#allocation2 + $0x30] sm:$0xff] }
  0x58   :  { %v335_v23 = vadd.f32 %v334_v9, %v308_v6  ;;  %v283_v13 = vsel %vm259_vm2, %v141_v41, 0.0  ;;  %v284_v24 = vsel %vm260_vm3, %v142_v27, 0.0  ;;  %v285_v25 = vsel %vm261_vm4, %v143_v45, 0.0  ;;  %v293_v6 = vld [vmem:[#allocation2 + $0x38] sm:$0xff] }
  0x59   :  { %v315_v26 = vmul.f32 %v283_v13, %v283_v13  ;;  %v316_v28 = vmul.f32 %v284_v24, %v284_v24  ;;  %v317_v32 = vmul.f32 %v285_v25, %v285_v25  ;;  %v212_v38 = vsel %vm204_vm5, 16843009, %v467_v14  ;;  %v385_v13 = vld [vmem:[%s780_s3 + $0x38] sm:$0xff] }
  0x5a   :  { %336 = vadd.xlane.f32.xlu0 %v335_v23  ;;  %v232_v40 = vunpack.c.0.s8 %v212_v38  ;;  %v233_v44 = vunpack.c.1.s8 %v212_v38  ;;  %v234_v46 = vunpack.c.2.s8 %v212_v38 }
  0x5b   :  { %v346_v39 = vadd.f32 %v316_v28, %v315_v26  ;;  %v384_v26 = vld [vmem:[%s780_s3 + $0x30] sm:$0xff] }
  0x5c   :  { %vm256_vm6 = vcmp.ne.s32.totalorder %v232_v40, 0  ;;  %vm257_vm7 = vcmp.ne.s32.totalorder %v233_v44, 0  ;;  %vm258_vm8 = vcmp.ne.s32.totalorder %v234_v46, 0 }
  0x5d   :  { %v347_v15 = vadd.f32 %v346_v39, %v317_v32  ;;  %v280_v20 = vsel %vm256_vm6, %v138_v19, 0.0  ;;  %v281_v21 = vsel %vm257_vm7, %v139_v33, 0.0  ;;  %v282_v22 = vsel %vm258_vm8, %v140_v34, 0.0 }
  0x5e   :  { %v312_v41 = vmul.f32 %v280_v20, %v280_v20  ;;  %v313_v27 = vmul.f32 %v281_v21, %v281_v21  ;;  %v314_v45 = vmul.f32 %v282_v22, %v282_v22 }
  0x5f   :  { %348 = vadd.xlane.f32.xlu1 %v347_v15 }
  0x60   :  { %v342_v47 = vadd.f32 %v313_v27, %v312_v41 }
  0x62   :  { %v343_v54 = vadd.f32 %v342_v47, %v314_v45 }
  0x64   :  { %344 = vadd.xlane.f32.xlu0 %v343_v54 }
  0xcb   :  { %v329_v14 = vpop.xlane.xlu1 %328 }
  0xcc   :  { %v352_v29 = vadd.f32 %v329_v14, %v288_v55 }
  0xcd   :  { %v321_v42 = vpop.xlane.xlu0 %320 }
  0xce   :  { %361 = vst.msk [vmem:[#allocation2 + $0x10] sm:$0xff] %vm51_vm0, %v352_v29  ;;  %v350_v30 = vadd.f32 %v321_v42, %v286_v35 }
  0xd0   :  { %359 = vst.msk [vmem:[#allocation2] sm:$0xff] %vm51_vm0, %v350_v30 }
  0xd2   :  { %v333_v56 = vpop.xlane.xlu1 %332 }
  0xd3   :  { %v353_v57 = vadd.f32 %v333_v56, %v289_v36 }
  0xd5   :  { %v372_v31 = vld [vmem:[#allocation2 + $0x10] sm:$0xff]  ;;  %362 = vst.msk [vmem:[#allocation2 + $0x18] sm:$0xff] %vm51_vm0, %v353_v57 }
  0xd6   :  { %v388_v37 = vmul.f32 %v380_v51, %v372_v31 }
  0xd7   :  { %v370_v60 = vld [vmem:[#allocation2] sm:$0xff]  ;;  %v325_v61 = vpop.xlane.xlu0 %324 }
  0xd8   :  { %396 = vst.msk [vmem:[%s781_s4 + $0x10] sm:$0xff] %vm51_vm0, %v388_v37  ;;  %v386_v62 = vmul.f32 %v378_v52, %v370_v60  ;;  %v351_v63 = vadd.f32 %v325_v61, %v287_v58 }
  0xda   :  { %394 = vst.msk [vmem:[%s781_s4] sm:$0xff] %vm51_vm0, %v386_v62  ;;  %360 = vst.msk [vmem:[#allocation2 + $0x8] sm:$0xff] %vm51_vm0, %v351_v63 }
  0xdc   :  { %v373_v1 = vld [vmem:[#allocation2 + $0x18] sm:$0xff] }
  0xdd   :  { %v389_v43 = vmul.f32 %v381_v0, %v373_v1 }
  0xdf   :  { %397 = vst.msk [vmem:[%s781_s4 + $0x18] sm:$0xff] %vm51_vm0, %v389_v43 }
  0xe1   :  { %v371_v53 = vld [vmem:[#allocation2 + $0x8] sm:$0xff] }
  0xe2   :  { %v387_v2 = vmul.f32 %v379_v49, %v371_v53 }
  0xe4   :  { %395 = vst.msk [vmem:[%s781_s4 + $0x8] sm:$0xff] %vm51_vm0, %v387_v2  ;;  %v341_v48 = vpop.xlane.xlu1 %340 }
  0xe5   :  { %v355_v50 = vadd.f32 %v341_v48, %v291_v3 }
  0xe7   :  { %364 = vst.msk [vmem:[#allocation2 + $0x28] sm:$0xff] %vm51_vm0, %v355_v50  ;;  %v337_v4 = vpop.xlane.xlu0 %336 }
  0xe8   :  { %v354_v5 = vadd.f32 %v337_v4, %v290_v59 }
  0xea   :  { %363 = vst.msk [vmem:[#allocation2 + $0x20] sm:$0xff] %vm51_vm0, %v354_v5 }
  0xec   :  { %v349_v8 = vpop.xlane.xlu1 %348 }
  0xed   :  { %v357_v9 = vadd.f32 %v349_v8, %v293_v6 }
  0xee   :  { %v375_v10 = vld [vmem:[#allocation2 + $0x28] sm:$0xff] }
  0xef   :  { %v391_v11 = vmul.f32 %v383_v7, %v375_v10  ;;  %366 = vst.msk [vmem:[#allocation2 + $0x38] sm:$0xff] %vm51_vm0, %v357_v9 }
  0xf1   :  { %399 = vst.msk [vmem:[%s781_s4 + $0x28] sm:$0xff] %vm51_vm0, %v391_v11  ;;  %v374_v17 = vld [vmem:[#allocation2 + $0x20] sm:$0xff]  ;;  %v345_v19 = vpop.xlane.xlu0 %344 }
  0xf2   :  { %v390_v18 = vmul.f32 %v382_v12, %v374_v17  ;;  %v356_v23 = vadd.f32 %v345_v19, %v292_v16 }
  0xf4   :  { %398 = vst.msk [vmem:[%s781_s4 + $0x20] sm:$0xff] %vm51_vm0, %v390_v18  ;;  %365 = vst.msk [vmem:[#allocation2 + $0x30] sm:$0xff] %vm51_vm0, %v356_v23 }
  0xf6   :  { %v377_v24 = vld [vmem:[#allocation2 + $0x38] sm:$0xff] }
  0xf7   :  { %v393_v25 = vmul.f32 %v385_v13, %v377_v24 }
  0xf9   :  { %401 = vst.msk [vmem:[%s781_s4 + $0x38] sm:$0xff] %vm51_vm0, %v393_v25 }
  0xfb   :  { %v376_v28 = vld [vmem:[#allocation2 + $0x30] sm:$0xff] }
  0xfc   :  { %v392_v32 = vmul.f32 %v384_v26, %v376_v28 }
  0xfe   :  { %400 = vst.msk [vmem:[%s781_s4 + $0x30] sm:$0xff] %vm51_vm0, %v392_v32 }
  0xff   :  { %406 = vsyncpa [#allocation4], 1 }
 0x100   :  { %407 = vsyncpa [#allocation6], 1 }

</bundles_post_ra>
